<compile_context>
chip_gen: v7x
topology: tpu7x:2x2x1
jax: 0.10.0
libtpu: 0.0.40
codegen_flags: <defaults>
</compile_context>

<pallas_src>
import functools

import jax
import jax.numpy as jnp
from jax.experimental import pallas as pl
from jax.experimental.pallas import tpu as pltpu

_BN_EPS = 1e-5
ACT_DTYPE = jnp.bfloat16          # inter-layer activation / matmul operand dtype
_VMEM_LIMIT = 32 * 1024 * 1024    # explicit budget; fits v7x's 64 MiB physical VMEM


def _round_up(v, m):
    return (v + m - 1) // m * m


def _cp(c):
    """Channel count padded to a lane-friendly multiple of 128."""
    return _round_up(c, 128)


# ---------------------------------------------------------------------------
# Pallas kernels
# ---------------------------------------------------------------------------
def _mm_bn_kernel(*refs, relu, has_res):
    """out = [relu]((A @ W) * scale + bias [+ residual]); single K block, fp32 acc."""
    if has_res:
        a_ref, w_ref, sb_ref, r_ref, o_ref = refs
    else:
        a_ref, w_ref, sb_ref, o_ref = refs
    acc = jnp.dot(a_ref[...], w_ref[...], preferred_element_type=jnp.float32)
    y = acc * sb_ref[0:1, :] + sb_ref[1:2, :]
    if has_res:
        y = y + r_ref[...].astype(jnp.float32)
    if relu:
        y = jnp.maximum(y, 0.0)
    o_ref[...] = y.astype(o_ref.dtype)


def _conv3x3_kernel(x_ref, w_ref, sb_ref, o_ref, *, stride, wq, ho, wo, relu):
    """Direct 3x3 conv via 9 statically shifted slices of the flattened padded input.

    x_ref : (stride*stride, Hq*Wq, Cin)  zero-padded input, row-major flattened,
            phase-split into the 4 stride-2 phases when stride == 2.
    w_ref : (9, Cin, tn) packed weights, sb_ref : (2, tn) BN scale/bias.
    o_ref : (1, L, tn) with L = (ho-1)*wq + wo; flat row p maps to spatial
            (p // wq, p % wq); columns p % wq >= wo are garbage and cropped
            by the wrapper.
    """
    ell = (ho - 1) * wq + wo
    acc = jnp.zeros((ell, o_ref.shape[-1]), jnp.float32)
    for t in range(9):
        di, dj = t // 3, t % 3
        ph = (di % stride) * stride + (dj % stride)
        off = (di // stride) * wq + (dj // stride)
        a = x_ref[ph, off:off + ell, :]
        acc = acc + jnp.dot(a, w_ref[t], preferred_element_type=jnp.float32)
    y = acc * sb_ref[0:1, :] + sb_ref[1:2, :]
    if relu:
        y = jnp.maximum(y, 0.0)
    o_ref[0] = y.astype(o_ref.dtype)


def _head_kernel(feat_ref, fcw_ref, fcb_ref, exif_ref, exw_ref, o_ref, *, inv_hw):
    """Global average pool + fc(2048,1) + exifCNN linear + add (fp32)."""
    f = jnp.sum(feat_ref[...].astype(jnp.float32), axis=1) * inv_hw      # (tb, 2048)
    generic = jnp.dot(f, fcw_ref[...], preferred_element_type=jnp.float32) + fcb_ref[...]
    bias = jnp.dot(exif_ref[...].astype(jnp.float32), exw_ref[...],
                   preferred_element_type=jnp.float32)
    o_ref[...] = generic + bias


# ---------------------------------------------------------------------------
# Pallas wrappers
# ---------------------------------------------------------------------------
def matmul_bn(a, w, sb, *, relu, residual=None, out_dtype=ACT_DTYPE):
    """(M, K) x (K, Np) fused matmul + BN scale/bias (+residual, +relu).

    w is pre-padded so Np % 128 == 0.  K is kept in one block (max 2048 in this
    net), so there is no reduction grid axis; the grid is (N tiles, M tiles)
    with M innermost so each weight tile is DMA'd only once.
    """
    M, K = a.shape
    _, Np = w.shape
    tm = min(256, _round_up(M, 8))
    tn = 256 if Np % 256 == 0 else 128
    gm, gn = pl.cdiv(M, tm), Np // tn

    inputs = [a, w, sb]
    in_specs = [
        pl.BlockSpec((tm, K), lambda j, i: (i, 0)),
        pl.BlockSpec((K, tn), lambda j, i: (0, j)),
        pl.BlockSpec((2, tn), lambda j, i: (0, j)),
    ]
    has_res = residual is not None
    if has_res:
        inputs.append(residual)
        in_specs.append(pl.BlockSpec((tm, tn), lambda j, i: (i, j)))

    flops = 2 * M * K * Np
    bytes_acc = (a.size * a.dtype.itemsize + w.size * w.dtype.itemsize
                 + M * Np * jnp.dtype(out_dtype).itemsize)
    out = pl.pallas_call(
        functools.partial(_mm_bn_kernel, relu=relu, has_res=has_res),
        out_shape=jax.ShapeDtypeStruct((M, Np), out_dtype),
        grid_spec=pltpu.PrefetchScalarGridSpec(
            num_scalar_prefetch=0,
            grid=(gn, gm),
            in_specs=in_specs,
            out_specs=pl.BlockSpec((tm, tn), lambda j, i: (i, j)),
        ),
        compiler_params=pltpu.CompilerParams(
            dimension_semantics=("parallel", "parallel"),
            vmem_limit_bytes=_VMEM_LIMIT),
        cost_estimate=pl.CostEstimate(flops=flops, transcendentals=0,
                                      bytes_accessed=bytes_acc),
    )(*inputs)
    return out


def conv1x1_bn(x, w, sb, *, stride=1, relu=True, residual=None):
    """1x1 conv + BN (+residual, +relu).  x: (N,H,W,Cinp) bf16, w: (Cinp, Coutp)."""
    if stride > 1:
        x = x[:, ::stride, ::stride, :]
    n, h, wd, cin = x.shape
    coutp = w.shape[-1]
    a = x.reshape(n * h * wd, cin)
    r = None if residual is None else residual.reshape(n * h * wd, coutp)
    out = matmul_bn(a, w, sb, relu=relu, residual=r)
    return out.reshape(n, h, wd, coutp)


def conv3x3_bn(x, w9, sb, *, stride, relu=True):
    """3x3 conv (pad 1, stride 1 or 2) + BN + relu via the flat-shift kernel."""
    n, h, wd, cin = x.shape
    coutp = w9.shape[-1]
    ho = (h + 2 - 3) // stride + 1
    wo = (wd + 2 - 3) // stride + 1
    xp = jnp.pad(x, ((0, 0), (1, 1), (1, 1), (0, 0)))
    hp, wp = h + 2, wd + 2
    ss = stride * stride
    if stride == 1:
        hq, wq = hp, wp
        x3 = xp.reshape(n, hq * wq, cin)                       # free reshape
    else:
        if hp % 2:                                             # keep phases equal-sized
            xp = jnp.pad(xp, ((0, 0), (0, 1), (0, 0), (0, 0)))
            hp += 1
        if wp % 2:
            xp = jnp.pad(xp, ((0, 0), (0, 0), (0, 1), (0, 0)))
            wp += 1
        hq, wq = hp // 2, wp // 2
        x3 = xp.reshape(n, hq, 2, wq, 2, cin).transpose(0, 2, 4, 1, 3, 5)
        x3 = x3.reshape(n * 4, hq * wq, cin)                   # (n*phases, Hq*Wq, Cin)

    ell = (ho - 1) * wq + wo
    tn = 256 if coutp % 256 == 0 else 128
    gj = coutp // tn
    flops = 2 * n * ho * wo * 9 * cin * coutp
    bytes_acc = x3.size * 2 * gj + w9.size * 2 + n * ell * coutp * 2

    out = pl.pallas_call(
        functools.partial(_conv3x3_kernel, stride=stride, wq=wq, ho=ho, wo=wo,
                          relu=relu),
        out_shape=jax.ShapeDtypeStruct((n, ell, coutp), ACT_DTYPE),
        grid_spec=pltpu.PrefetchScalarGridSpec(
            num_scalar_prefetch=0,
            grid=(gj, n),                                      # batch innermost -> W reused
            in_specs=[
                pl.BlockSpec((ss, hq * wq, cin), lambda j, b: (b, 0, 0)),
                pl.BlockSpec((9, cin, tn), lambda j, b: (0, 0, j)),
                pl.BlockSpec((2, tn), lambda j, b: (0, j)),
            ],
            out_specs=pl.BlockSpec((1, ell, tn), lambda j, b: (b, 0, j)),
        ),
        compiler_params=pltpu.CompilerParams(
            dimension_semantics=("parallel", "parallel"),
            vmem_limit_bytes=_VMEM_LIMIT),
        cost_estimate=pl.CostEstimate(flops=flops, transcendentals=0,
                                      bytes_accessed=bytes_acc),
    )(x3, w9, sb)

    # un-flatten: pad the short tail, fold back to (n, ho, wq, C), crop pad cols.
    out = jnp.pad(out, ((0, 0), (0, ho * wq - ell), (0, 0)))
    out = out.reshape(n, ho, wq, coutp)[:, :, :wo, :]
    return out


def conv1_7x7(x, w147, sb):
    """7x7/s2/p3 stem conv + BN + relu.

    TODO(synk): the stem still uses an im2col patch tensor (49*3 columns); it is
    cheap because Cin=3, unlike the 3x3 layers which use the direct kernel.
    """
    n, h, wd, cin = x.shape
    stride, pad, k = 2, 3, 7
    ho = (h + 2 * pad - k) // stride + 1
    wo = (wd + 2 * pad - k) // stride + 1
    xp = jnp.pad(x, ((0, 0), (pad, pad), (pad, pad), (0, 0)))
    cols = [xp[:, di:di + stride * (ho - 1) + 1:stride,
               dj:dj + stride * (wo - 1) + 1:stride, :]
            for di in range(k) for dj in range(k)]
    patches = jnp.concatenate(cols, axis=-1).reshape(n * ho * wo, k * k * cin)
    out = matmul_bn(patches, w147, sb, relu=True)
    return out.reshape(n, ho, wo, -1)


def maxpool_3x3_s2_p1(x):
    """3x3/s2/p1 max pool as an XLA-fused max over the 9 shifted strided views
    (per perf review: no (9,M,C) HBM intermediate, no whole-array VMEM residency)."""
    n, h, w, c = x.shape
    ho = (h - 1) // 2 + 1
    wo = (w - 1) // 2 + 1
    xp = jnp.pad(x, ((0, 0), (1, 1), (1, 1), (0, 0)), constant_values=-jnp.inf)
    out = None
    for di in range(3):
        for dj in range(3):
            v = xp[:, di:di + 2 * (ho - 1) + 1:2, dj:dj + 2 * (wo - 1) + 1:2, :]
            out = v if out is None else jnp.maximum(out, v)
    return out


def head(feat, fc_w, fc_b, exif, exif_w):
    """AdaptiveAvgPool(1) + Linear(2048,1) + exifCNN Linear(C_exif,1) + add."""
    n, h, w, c = feat.shape
    hw = h * w
    feat3 = feat.reshape(n, hw, c)
    ce = exif.shape[1]
    tb = min(n, 8)
    gb = pl.cdiv(n, tb)
    out = pl.pallas_call(
        functools.partial(_head_kernel, inv_hw=1.0 / hw),
        out_shape=jax.ShapeDtypeStruct((n, 128), jnp.float32),
        grid_spec=pltpu.PrefetchScalarGridSpec(
            num_scalar_prefetch=0,
            grid=(gb,),
            in_specs=[
                pl.BlockSpec((tb, hw, c), lambda b: (b, 0, 0)),
                pl.BlockSpec((c, 128), lambda b: (0, 0)),
                pl.BlockSpec((1, 128), lambda b: (0, 0)),
                pl.BlockSpec((tb, ce), lambda b: (b, 0)),
                pl.BlockSpec((ce, 128), lambda b: (0, 0)),
            ],
            out_specs=pl.BlockSpec((tb, 128), lambda b: (b, 0)),
        ),
        compiler_params=pltpu.CompilerParams(
            dimension_semantics=("parallel",),
            vmem_limit_bytes=_VMEM_LIMIT),
    )(feat3, fc_w, fc_b, exif, exif_w)
    return out[:, :1]


# ---------------------------------------------------------------------------
# Parameter packing (done once; padded / reshaped / cast to bf16 at build time)
# ---------------------------------------------------------------------------
def _bn_scale_bias(c, cpad):
    # TODO(synk): BatchNorm is folded in inference mode from freshly initialized
    # running stats (mean=0, var=1, gamma=1, beta=0); a trained checkpoint's
    # stats would be folded identically into (scale, bias).
    gamma = jnp.ones((c,), jnp.float32)
    beta = jnp.zeros((c,), jnp.float32)
    mean = jnp.zeros((c,), jnp.float32)
    var = jnp.ones((c,), jnp.float32)
    scale = gamma * jax.lax.rsqrt(var + _BN_EPS)
    bias = beta - mean * scale
    sb = jnp.stack([scale, bias])                      # (2, c)
    return jnp.pad(sb, ((0, 0), (0, cpad - c)))        # padded channels: 0*acc+0 = 0


def _pack_w_1x1(w, cinp, coutp):
    cin, cout = w.shape
    return jnp.pad(w, ((0, cinp - cin), (0, coutp - cout))).astype(ACT_DTYPE)


def _pack_w_3x3(w, cinp, coutp):
    kh, kw, cin, cout = w.shape
    w = w.reshape(kh * kw, cin, cout)
    return jnp.pad(w, ((0, 0), (0, cinp - cin), (0, coutp - cout))).astype(ACT_DTYPE)


def build_params(key, exif_channels):
    keys = iter(jax.random.split(key, 64))

    def conv_w(kh, kw, cin, cout):
        fan_in = kh * kw * cin
        return (jax.random.normal(next(keys), (kh, kw, cin, cout), jnp.float32)
                * (2.0 / fan_in) ** 0.5)

    params = {}
    w1 = conv_w(7, 7, 3, 64).reshape(49 * 3, 64)
    params['conv1_w'] = jnp.pad(w1, ((0, 0), (0, _cp(64) - 64))).astype(ACT_DTYPE)
    params['conv1_sb'] = _bn_scale_bias(64, _cp(64))

    blocks = []
    in_c = 64
    for planes, n_blocks, stride in [(64, 3, 1), (128, 4, 2), (256, 6, 2), (512, 3, 2)]:
        for i in range(n_blocks):
            s = stride if i == 0 else 1
            cinp, pp, outp = _cp(in_c), _cp(planes), _cp(planes * 4)
            blk = {'stride': s}
            blk['w1'] = _pack_w_1x1(conv_w(1, 1, in_c, planes)[0, 0], cinp, pp)
            blk['sb1'] = _bn_scale_bias(planes, pp)
            blk['w2'] = _pack_w_3x3(conv_w(3, 3, planes, planes), pp, pp)
            blk['sb2'] = _bn_scale_bias(planes, pp)
            blk['w3'] = _pack_w_1x1(conv_w(1, 1, planes, planes * 4)[0, 0], pp, outp)
            blk['sb3'] = _bn_scale_bias(planes * 4, outp)
            if i == 0:
                blk['wd'] = _pack_w_1x1(conv_w(1, 1, in_c, planes * 4)[0, 0], cinp, outp)
                blk['sbd'] = _bn_scale_bias(planes * 4, outp)
            blocks.append(blk)
            in_c = planes * 4
    params['blocks'] = blocks

    fc_in = 2048
    lim = 1.0 / (fc_in ** 0.5)
    fc_w = jax.random.uniform(next(keys), (fc_in, 1), jnp.float32, -lim, lim)
    fc_b = jax.random.uniform(next(keys), (1,), jnp.float32, -lim, lim)
    params['fc_w'] = jnp.pad(fc_w, ((0, 0), (0, 127)))
    params['fc_b'] = jnp.pad(fc_b.reshape(1, 1), ((0, 0), (0, 127)))
    lim_e = 1.0 / (exif_channels ** 0.5)
    exw = jax.random.uniform(next(keys), (exif_channels, 1), jnp.float32, -lim_e, lim_e)
    params['exif_w'] = jnp.pad(exw, ((0, 0), (0, 127)))
    return params


# ---------------------------------------------------------------------------
# ResNet-50 bottleneck + MTE forward
# ---------------------------------------------------------------------------
def bottleneck(blk, x):
    s = blk['stride']
    identity = x
    out = conv1x1_bn(x, blk['w1'], blk['sb1'], relu=True)
    out = conv3x3_bn(out, blk['w2'], blk['sb2'], stride=s, relu=True)
    if 'wd' in blk:
        identity = conv1x1_bn(x, blk['wd'], blk['sbd'], stride=s, relu=False)
    # conv3 + bn3 + residual add + relu fused in one kernel epilogue
    out = conv1x1_bn(out, blk['w3'], blk['sb3'], relu=True, residual=identity)
    return out


def mte_forward(params, x_nchw, exif):
    x = jnp.transpose(x_nchw, (0, 2, 3, 1)).astype(ACT_DTYPE)    # NCHW -> NHWC bf16
    x = conv1_7x7(x, params['conv1_w'], params['conv1_sb'])
    x = maxpool_3x3_s2_p1(x)
    for blk in params['blocks']:
        x = bottleneck(blk, x)
    # generic = backbone(x); bias = exifCNN(exif); return generic + bias
    return head(x, params['fc_w'], params['fc_b'], exif, params['exif_w'])


if __name__ == "__main__":
    key = jax.random.PRNGKey(0)
    kp, kx, ke = jax.random.split(key, 3)

    EXIF_CHANNELS = 8                        # config.input_channels
    params = build_params(kp, EXIF_CHANNELS)

    x = jax.random.normal(kx, (2, 3, 64, 64), jnp.float32)       # NCHW, like PyTorch
    exif = jax.random.normal(ke, (2, EXIF_CHANNELS), jnp.float32)

    out = mte_forward(params, x, exif)
    out = jax.block_until_ready(out)

    assert out.shape == (2, 1), out.shape
    assert bool(jnp.isfinite(out).all())
    print("KERNEL_OK")
</pallas_src>

<mosaic_0001>
module attributes {stable_mosaic.version = 11 : i64} {
  func.func @_mm_bn_kernel(%arg0: i32, %arg1: i32, %arg2: memref<256x147xbf16, #tpu.memory_space<vmem>>, %arg3: memref<147x128xbf16, #tpu.memory_space<vmem>>, %arg4: memref<2x128xf32, #tpu.memory_space<vmem>>, %arg5: memref<256x128xbf16, #tpu.memory_space<vmem>>) attributes {dimension_semantics = [#tpu.dimension_semantics<parallel>, #tpu.dimension_semantics<parallel>], iteration_bounds = array<i64: 1, 8>, scalar_prefetch = 0 : i64, scratch_operands = 0 : i64, tpu.core_type = #tpu.core_type<tc>, window_params = [{transform_indices = @transform_0, window_bounds = array<i64: 256, 147>}, {transform_indices = @transform_1, window_bounds = array<i64: 147, 128>}, {transform_indices = @transform_2, window_bounds = array<i64: 2, 128>}, {transform_indices = @transform_3, window_bounds = array<i64: 256, 128>}]} {
    %c0 = arith.constant 0 : index
    %c0_0 = arith.constant 0 : index
    %0 = vector.load %arg2[%c0, %c0_0] : memref<256x147xbf16, #tpu.memory_space<vmem>>, vector<256x147xbf16>
    %c0_1 = arith.constant 0 : index
    %c0_2 = arith.constant 0 : index
    %1 = vector.load %arg3[%c0_1, %c0_2] : memref<147x128xbf16, #tpu.memory_space<vmem>>, vector<147x128xbf16>
    %cst = arith.constant dense<0.000000e+00> : vector<256x128xf32>
    %2 = tpu.matmul %0, %1, %cst {dimension_numbers = #tpu.dot_dimension_numbers<[1], [0], [0], [1], [0, 0, 1, 1], [], []>} : vector<256x147xbf16>, vector<147x128xbf16>, vector<256x128xf32> -> vector<256x128xf32>
    %c0_3 = arith.constant 0 : index
    %c0_4 = arith.constant 0 : index
    %3 = vector.load %arg4[%c0_3, %c0_4] : memref<2x128xf32, #tpu.memory_space<vmem>>, vector<1x128xf32>
    %4 = vector.broadcast %3 : vector<1x128xf32> to vector<256x128xf32>
    %5 = arith.mulf %2, %4 : vector<256x128xf32>
    %c1 = arith.constant 1 : index
    %c0_5 = arith.constant 0 : index
    %6 = vector.load %arg4[%c1, %c0_5] : memref<2x128xf32, #tpu.memory_space<vmem>>, vector<1x128xf32>
    %7 = vector.broadcast %6 : vector<1x128xf32> to vector<256x128xf32>
    %8 = arith.addf %5, %7 : vector<256x128xf32>
    %cst_6 = arith.constant 0.000000e+00 : f32
    %9 = vector.broadcast %cst_6 : f32 to vector<256x128xf32>
    %10 = arith.maximumf %8, %9 : vector<256x128xf32>
    %11 = arith.truncf %10 : vector<256x128xf32> to vector<256x128xbf16>
    %c0_7 = arith.constant 0 : index
    %c0_8 = arith.constant 0 : index
    %12 = vector.load %arg5[%c0_7, %c0_8] : memref<256x128xbf16, #tpu.memory_space<vmem>>, vector<256x128xbf16>
    tpu.vector_store %arg5[%c0_7, %c0_8], %11 {strides = array<i32>} : memref<256x128xbf16, #tpu.memory_space<vmem>>, vector<256x128xbf16>,
    return
  }
  func.func @transform_0(%arg0: i32, %arg1: i32) -> (i32, i32) {
    %c0_i32 = arith.constant 0 : i32
    %c0_i32_0 = arith.constant 0 : i32
    return %arg1, %c0_i32 : i32, i32
  }
  func.func @transform_1(%arg0: i32, %arg1: i32) -> (i32, i32) {
    %c0_i32 = arith.constant 0 : i32
    %c0_i32_0 = arith.constant 0 : i32
    return %c0_i32, %arg0 : i32, i32
  }
  func.func @transform_2(%arg0: i32, %arg1: i32) -> (i32, i32) {
    %c0_i32 = arith.constant 0 : i32
    %c0_i32_0 = arith.constant 0 : i32
    return %c0_i32, %arg0 : i32, i32
  }
  func.func @transform_3(%arg0: i32, %arg1: i32) -> (i32, i32) {
    %c0_i32 = arith.constant 0 : i32
    return %arg1, %arg0 : i32, i32
  }
}

</mosaic_0001>

<bundles_post_ra>
// kernel: tpu_custom_call.1
= control target key start
LH: loop header
LB: loop body
LE: loop exit
PB: predicated region body
PF: predicated region fallthrough
CT: control target
= control target key end

     0   :  { %8 = vsyncpa [#allocation3], 0  ;;  %s1846_s0 = inlined_call_operand.vmem [shape: bf16[2048,147], index: 0, kind: input, shape index: {}]   ;;  %s1847_s1 = inlined_call_operand.vmem [shape: bf16[147,128], index: 1, kind: input, shape index: {}]   ;;  %s1848_s2 = inlined_call_operand.vmem [shape: f32[2,128], index: 2, kind: input, shape index: {}]   ;;  %s1849_s3 = inlined_call_operand.hbm [shape: bf16[2048,128], index: 3, kind: output, shape index: {}]  }
   0x1   :  { %10 = vsyncpa [#allocation3 + $0x1], 0  ;;  %s1555_s12 = smov 0   ;;  %s1557_s13 = smov 0  }
   0x2   :  { %s1559_s14 = smov 0   ;;  %s1561_s15 = smov 0  }
   0x3   :  { %s1563_s16 = smov 0   ;;  %s1565_s17 = smov 0  }
   0x4 LB: > { %s1076_s18 = sadd.s32 4294967295, %s1528_s17   ;;  %s1077_s19 = sadd.s32 4294967294, %s1528_s17   ;;  %s1528_s17 = sphi %s1565_s17, %s16_s17   ;;  %s1524_s16 = sphi %s1563_s16, %s1856_s16   ;;  %s1520_s15 = sphi %s1561_s15, %s1855_s15   ;;  %s1516_s14 = sphi %s1559_s14, %s1854_s14   ;;  %s1512_s13 = sphi %s1557_s13, %s1853_s13   ;;  %s1508_s12 = sphi %s1555_s12, %s1852_s12  }
   0x5   : > { %s25_s20 = sadd.s32 1, %s1524_s16  ;;  %s115_s21 = sadd.s32 1, %s1516_s14 }
   0x6   : > { %p26_p0 = scmp.ge.s32.totalorder %s25_s20, 8  ;;  %p125_p1 = scmp.ne.s32.totalorder %s1516_s14, %s1512_s13 }
   0x7   : > { %p126_p2 = scmp.eq.s32.totalorder %s1076_s18, 7  ;;  %p131_p3 = scmp.ne.s32.totalorder %s1512_s13, %s1508_s12 }
   0x8   : > { %s1858_s20 = smov (%p26_p0, %s25_s20), 0  ;;  %p132_p5 = scmp.eq.s32.totalorder %s1077_s19, 7 }
   0x9   : > { %p1595_p4 = por %p126_p2, %p125_p1  ;;  %s110_s23 = ssub.s32 %s1524_s16, %s1858_s20 }
   0xa   : > { %p1082_p6 = scmp.ge.s32.totalorder %s1528_s17, 1  ;;  %p113_p7 = scmp.eq.s32.totalorder %s110_s23, 0 }
   0xb   : > { %p1602_p8 = por %p132_p5, %p131_p3  ;;  %p174_p9 = scmp.lt.s32.totalorder %s1528_s17, 9 }
   0xc   : > { %s1608_s25 = scalar_select %p113_p7, %s1516_s14, %s115_s21  }
   0xd   : > { %p175_p10 = pnand %p1082_p6, %p174_p9 }
   0xe   : > { %v1392_v0 = vld [vmem:[%s1847_s1] sm:$0xff] (!%p175_p10)   ;;  %v1530_v1 = vmov (!%p175_p10), 0   ;;  %v1393_v2 = vld [vmem:[%s1847_s1 + $0x8] sm:$0xff] (!%p175_p10)   ;;  %v1394_v3 = vld [vmem:[%s1847_s1 + $0x10] sm:$0xff] (!%p175_p10)   ;;  %s1084_s5 = sshll.u32 (!%p175_p10), %s1520_s15, 5  ;;  %vm476_vm0 = vcmask (!%p175_p10), 154624  }
   0xf   : > { %178 = sbr.rel (%p175_p10) target bundleno = 349 (0x15d), region = 32  ;;  %532 = vmatprep.subr.bf16.mxu0 (!%p175_p10), %v1530_v1  ;;  %1313 = vmatprep.subr.bf16.mxu1 (!%p175_p10), %v1530_v1  ;;  %p208_p11 = scmp.lt.s32.totalorder (!%p175_p10), %s1084_s5, 255  ;;  %v1395_v4 = vld [vmem:[%s1847_s1 + $0x18] sm:$0xff] (!%p175_p10)   ;;  %v1396_v5 = vld [vmem:[%s1847_s1 + $0x20] sm:$0xff] (!%p175_p10)   ;;  %v1397_v8 = vld [vmem:[%s1847_s1 + $0x28] sm:$0xff] (!%p175_p10)   ;;  %vm525_vm1 = vcmask (!%p175_p10), 1040384  }
  0x10   : > { %533 = vmatpush1.bf16.msra.mxu0 (!%p175_p10), %v1392_v0  ;;  %1323 = vmatpush1.bf16.msra.mxu1 (!%p175_p10), %v1392_v0  ;;  %v1398_v9 = vld [vmem:[%s1847_s1 + $0x30] sm:$0xff] (!%p175_p10)   ;;  %v1399_v10 = vld [vmem:[%s1847_s1 + $0x38] sm:$0xff] (!%p175_p10)   ;;  %vm526_vm2 = vcmask (!%p175_p10), 1041408   ;;  %v1531_v11 = vmov (!%p175_p10), 65535   ;;  %v1400_v13 = vld [vmem:[%s1847_s1 + $0x40] sm:$0xff] (!%p175_p10)   ;;  %s1217_s21 = sshll.u32 (!%p175_p10), %s1520_s15, 11 }
  0x11   : > { %534 = vmatprep.subr.bf16.mxu0 (!%p175_p10), %v1530_v1  ;;  %1314 = vmatprep.subr.bf16.mxu1 (!%p175_p10), %v1530_v1  ;;  %v527_v12 = vsel (!%p175_p10), %vm525_vm1, 4294967295, %v1531_v11  ;;  %v1401_v14 = vld [vmem:[%s1847_s1 + $0x48] ss:$0 sps:$4 sm:$0x33] (!%p175_p10)   ;;  %v1697_v47 = vld [vmem:[%s1848_s2] ss:$0 sm:$0xff] (!%p175_p10)  ;;  %s1792_s28 = scalar_lea.hbm (!%p175_p10), %s1849_s3, %s1217_s21 }
  0x12   : > { %v528_v15 = vsel (!%p175_p10), %vm526_vm2, %v527_v12, 0  ;;  %v1702_v49 = vld [vmem:[%s1848_s2 + $0x1] ss:$0 sm:$0xff] (!%p175_p10)  ;;  %s1532_s30 = smov (!%p175_p10), [#allocation2]  }
  0x13   : > { %v530_v16 = vand.u32 (!%p175_p10), %v1401_v14, %v528_v15  ;;  %s1454_s4 = sshll.u32 (!%p175_p10), %s1532_s30, 4  ;;  %s1455_s4 = int_to_ptr.vmem [resolvable:$false] %s1454_s4 }
  0x14   : > { %535 = vmatpush1.bf16.msra.mxu0 (!%p175_p10), %v1393_v2  ;;  %1324 = vmatpush1.bf16.msra.mxu1 (!%p175_p10), %v1393_v2 }
  0x15   : > { %536 = vmatprep.subr.bf16.mxu0 (!%p175_p10), %v1530_v1  ;;  %1315 = vmatprep.subr.bf16.mxu1 (!%p175_p10), %v1530_v1 }
  0x16   : > { %s1860_s5 = smov (!%p208_p11, %s1084_s5), 255 }
  0x17   : > { %s1184_s8 = sshll.u32 %s1860_s5, 3  ;;  %s1456_s5 = scalar_lea.vmem %s1455_s4, 4096 }
  0x18   : > { %537 = vmatpush1.bf16.msra.mxu0 %v1394_v3  ;;  %1325 = vmatpush1.bf16.msra.mxu1 %v1394_v3  ;;  %s1626_s11 = scalar_lea.vmem %s1846_s0, %s1184_s8 }
  0x19   : > { %538 = vmatprep.subr.bf16.mxu0 %v1530_v1  ;;  %1316 = vmatprep.subr.bf16.mxu1 %v1530_v1  ;;  %v1404_v6 = vld [vmem:[%s1626_s11 + $0x4] ss:$8 sps:$4 sm:$0xff]   ;;  %v1402_v17 = vld [vmem:[%s1626_s11] ss:$8 sps:$4 sm:$0xff]   ;;  %v1408_v19 = vld [vmem:[%s1626_s11 + $0x14] ss:$8 sps:$4 sm:$0xff]  }
  0x1a   : > { %v1407_v7 = vld [vmem:[%s1626_s11 + $0x84] ss:$8 sps:$4 sm:$0xff]   ;;  %1129 = vmatprep.mubr.msk.bf16.mxu0 %vm476_vm0, %v1404_v6  ;;  %v1405_v18 = vld [vmem:[%s1626_s11 + $0x80] ss:$8 sps:$4 sm:$0xff]   ;;  %v1410_v20 = vld [vmem:[%s1626_s11 + $0x94] ss:$8 sps:$4 sm:$0xff]  }
  0x1b   : > { %1137 = vmatprep.mubr.msk.bf16.mxu1 %vm476_vm0, %v1407_v7  ;;  %v1412_v21 = vld [vmem:[%s1626_s11 + $0x10] ss:$8 sps:$4 sm:$0xff]   ;;  %v1414_v23 = vld [vmem:[%s1626_s11 + $0x24] ss:$8 sps:$4 sm:$0xff]   ;;  %v1418_v25 = vld [vmem:[%s1626_s11 + $0x20] ss:$8 sps:$4 sm:$0xff]  }
  0x1c   : > { %539 = vmatpush1.bf16.msra.mxu0 %v1395_v4  ;;  %1326 = vmatpush1.bf16.msra.mxu1 %v1395_v4  ;;  %v1413_v22 = vld [vmem:[%s1626_s11 + $0x90] ss:$8 sps:$4 sm:$0xff]   ;;  %v1416_v24 = vld [vmem:[%s1626_s11 + $0xa4] ss:$8 sps:$4 sm:$0xff]   ;;  %v1419_v26 = vld [vmem:[%s1626_s11 + $0xa0] ss:$8 sps:$4 sm:$0xff]  }
  0x1d   : > { %540 = vmatprep.subr.bf16.mxu0 %v1530_v1  ;;  %1317 = vmatprep.subr.bf16.mxu1 %v1530_v1  ;;  %v1420_v27 = vld [vmem:[%s1626_s11 + $0x34] ss:$8 sps:$4 sm:$0xff]   ;;  %v1424_v29 = vld [vmem:[%s1626_s11 + $0x30] ss:$8 sps:$4 sm:$0xff]   ;;  %v1426_v31 = vld [vmem:[%s1626_s11 + $0x44] ss:$8 sps:$4 sm:$0xff]  }
  0x1e   : > { %v1422_v28 = vld [vmem:[%s1626_s11 + $0xb4] ss:$8 sps:$4 sm:$0xff]   ;;  %v1425_v30 = vld [vmem:[%s1626_s11 + $0xb0] ss:$8 sps:$4 sm:$0xff]   ;;  %v1428_v32 = vld [vmem:[%s1626_s11 + $0xc4] ss:$8 sps:$4 sm:$0xff]  }
  0x1f   : > { %v1430_v33 = vld [vmem:[%s1626_s11 + $0x40] ss:$8 sps:$4 sm:$0xff]   ;;  %v1432_v35 = vld [vmem:[%s1626_s11 + $0x54] ss:$8 sps:$4 sm:$0xff]   ;;  %v1436_v37 = vld [vmem:[%s1626_s11 + $0x50] ss:$8 sps:$4 sm:$0xff]  }
  0x20   : > { %541 = vmatpush1.bf16.msra.mxu0 %v1396_v5  ;;  %1327 = vmatpush1.bf16.msra.mxu1 %v1396_v5  ;;  %v1431_v34 = vld [vmem:[%s1626_s11 + $0xc0] ss:$8 sps:$4 sm:$0xff]   ;;  %v1434_v36 = vld [vmem:[%s1626_s11 + $0xd4] ss:$8 sps:$4 sm:$0xff]   ;;  %v1437_v38 = vld [vmem:[%s1626_s11 + $0xd0] ss:$8 sps:$4 sm:$0xff]  }
  0x21   : > { %542 = vmatprep.subr.bf16.mxu0 %v1530_v1  ;;  %1318 = vmatprep.subr.bf16.mxu1 %v1530_v1  ;;  %v1438_v39 = vld [vmem:[%s1626_s11 + $0x64] ss:$8 sps:$4 sm:$0xff]   ;;  %v1442_v41 = vld [vmem:[%s1626_s11 + $0x60] ss:$8 sps:$4 sm:$0xff]   ;;  %v1444_v43 = vld [vmem:[%s1626_s11 + $0x74] ss:$8 sps:$4 sm:$0xff]  }
  0x22   : > { %v1440_v40 = vld [vmem:[%s1626_s11 + $0xe4] ss:$8 sps:$4 sm:$0xff]   ;;  %v1443_v42 = vld [vmem:[%s1626_s11 + $0xe0] ss:$8 sps:$4 sm:$0xff]   ;;  %v1446_v44 = vld [vmem:[%s1626_s11 + $0xf4] ss:$8 sps:$4 sm:$0xff]  }
  0x23   : > { %v1448_v45 = vld [vmem:[%s1626_s11 + $0x70] ss:$8 sps:$4 sm:$0xff]  }
  0x24   : > { %543 = vmatpush1.bf16.msra.mxu0 %v1397_v8  ;;  %1328 = vmatpush1.bf16.msra.mxu1 %v1397_v8  ;;  %v1449_v46 = vld [vmem:[%s1626_s11 + $0xf0] ss:$8 sps:$4 sm:$0xff]   ;;  %s204_s11 = sand.u32 1, %s1512_s13  }
  0x25   : > { %544 = vmatprep.subr.bf16.mxu0 %v1530_v1  ;;  %1319 = vmatprep.subr.bf16.mxu1 %v1530_v1  ;;  %s1083_s18 = sshll.u32 %s204_s11, 7  ;;  %s1800_s15 = scalar_lea.sflag [#allocation3], %s204_s11 }
  0x26   : > { %s1717_s19 = scalar_lea.vmem [#allocation2], %s1083_s18 }
  0x27   : > { %s974_s23 = sshll.u32 %s1717_s19, 4  ;;  %s1794_s23 = int_to_ptr.vmem [resolvable:$true] %s974_s23 }
  0x28   : > { %545 = vmatpush1.bf16.msra.mxu0 %v1398_v9  ;;  %1329 = vmatpush1.bf16.msra.mxu1 %v1398_v9  ;;  %s1450_s29 = scalar_lea.vmem %s1794_s23, 2048  ;;  %p1457_p1 = scmp.lt.s32.totalorder %s1794_s23, %s1455_s4 }
  0x29   : > { %546 = vmatprep.subr.bf16.mxu0 %v1530_v1  ;;  %1320 = vmatprep.subr.bf16.mxu1 %v1530_v1  ;;  %p1451_p12 = scmp.ne.s32.totalorder %s1794_s23, %s1450_s29  ;;  %p1458_p2 = scmp.lt.s32.totalorder %s1456_s5, %s1450_s29 }
  0x2b   : > { %p1452_p13 = pnand %p1451_p12, %p1595_p4  ;;  %p1459_p3 = por %p1458_p2, %p1457_p1 }
  0x2c   : > { %547 = vmatpush1.bf16.msra.mxu0 %v1399_v10  ;;  %1330 = vmatpush1.bf16.msra.mxu1 %v1399_v10 }
  0x2d   : > { %548 = vmatprep.subr.bf16.mxu0 %v1530_v1  ;;  %1321 = vmatprep.subr.bf16.mxu1 %v1530_v1  ;;  %p1453_p0 = pneg %p1452_p13 }
  0x2f   : > { %p1460_p5 = pnand %p1459_p3, %p1453_p0 }
  0x30   : > { %549 = vmatpush1.bf16.msra.mxu0 %v1400_v13  ;;  %1331 = vmatpush1.bf16.msra.mxu1 %v1400_v13 }
  0x31   : > { %550 = vmatprep.subr.bf16.mxu0 %v1530_v1  ;;  %1322 = vmatprep.subr.bf16.mxu1 %v1530_v1 }
  0x34   : > { %551 = vmatpush1.bf16.msra.mxu0 %v530_v16  ;;  %1332 = vmatpush1.bf16.msra.mxu1 %v530_v16 }
  0x37   : > { %565 = vmatmul.mubr.bf16.vlgmr.msra.gmra.mrb[0].mxu0 %v1402_v17  ;;  %629 = vmatmul.mubr.bf16.vlgmr.msra.gmra.mrb[0].mxu1 %v1405_v18 }
  0x38   : > { %1130 = vmatprep.mubr.msk.bf16.mxu0 %vm476_vm0, %v1408_v19  ;;  %1138 = vmatprep.mubr.msk.bf16.mxu1 %vm476_vm0, %v1410_v20 }
  0x3f   : > { %573 = vmatmul.mubr.bf16.gmra.mrb[4].mxu0 %v1412_v21  ;;  %637 = vmatmul.mubr.bf16.gmra.mrb[4].mxu1 %v1413_v22 }
  0x40   : > { %1131 = vmatprep.mubr.msk.bf16.mxu0 %vm476_vm0, %v1414_v23  ;;  %1139 = vmatprep.mubr.msk.bf16.mxu1 %vm476_vm0, %v1416_v24 }
  0x47   : > { %581 = vmatmul.mubr.bf16.gmra.mrb[8].mxu0 %v1418_v25  ;;  %645 = vmatmul.mubr.bf16.gmra.mrb[8].mxu1 %v1419_v26 }
  0x48   : > { %1132 = vmatprep.mubr.msk.bf16.mxu0 %vm476_vm0, %v1420_v27  ;;  %1140 = vmatprep.mubr.msk.bf16.mxu1 %vm476_vm0, %v1422_v28 }
  0x4f   : > { %589 = vmatmul.mubr.bf16.gmra.mrb[12].mxu0 %v1424_v29  ;;  %653 = vmatmul.mubr.bf16.gmra.mrb[12].mxu1 %v1425_v30 }
  0x50   : > { %1133 = vmatprep.mubr.msk.bf16.mxu0 %vm476_vm0, %v1426_v31  ;;  %1141 = vmatprep.mubr.msk.bf16.mxu1 %vm476_vm0, %v1428_v32 }
  0x57   : > { %597 = vmatmul.mubr.bf16.gmra.mrb[16].mxu0 %v1430_v33  ;;  %661 = vmatmul.mubr.bf16.gmra.mrb[16].mxu1 %v1431_v34 }
  0x58   : > { %1134 = vmatprep.mubr.msk.bf16.mxu0 %vm476_vm0, %v1432_v35  ;;  %1142 = vmatprep.mubr.msk.bf16.mxu1 %vm476_vm0, %v1434_v36 }
  0x5f   : > { %605 = vmatmul.mubr.bf16.gmra.mrb[20].mxu0 %v1436_v37  ;;  %669 = vmatmul.mubr.bf16.gmra.mrb[20].mxu1 %v1437_v38 }
  0x60   : > { %1135 = vmatprep.mubr.msk.bf16.mxu0 %vm476_vm0, %v1438_v39  ;;  %1143 = vmatprep.mubr.msk.bf16.mxu1 %vm476_vm0, %v1440_v40 }
  0x67   : > { %613 = vmatmul.mubr.bf16.gmra.mrb[24].mxu0 %v1442_v41  ;;  %677 = vmatmul.mubr.bf16.gmra.mrb[24].mxu1 %v1443_v42 }
  0x68   : > { %1136 = vmatprep.mubr.msk.bf16.mxu0 %vm476_vm0, %v1444_v43  ;;  %1144 = vmatprep.mubr.msk.bf16.mxu1 %vm476_vm0, %v1446_v44 }
  0x6f   : > { %621 = vmatmul.mubr.bf16.gmra.mrb[28].mxu0 %v1448_v45  ;;  %685 = vmatmul.mubr.bf16.gmra.mrb[28].mxu1 %v1449_v46 }
 0x10a   : > { %v566_v48 = vpop.f32.mrb[0].mxu0  ;;  %v630_v50 = vpop.f32.mrb[0].mxu1 }
 0x10b   : > { %v698_v51 = vmul.f32 %v1697_v47, %v566_v48  ;;  %v714_v52 = vmul.f32 %v1697_v47, %v630_v50  ;;  %v568_v53 = vpop.f32.mrb[1].mxu0  ;;  %v632_v54 = vpop.f32.mrb[1].mxu1 }
 0x10c   : > { %v569_v55 = vpop.f32.mrb[2].mxu0  ;;  %v633_v56 = vpop.f32.mrb[2].mxu1 }
 0x10d   : > { %v735_v57 = vadd.f32 %v1702_v49, %v698_v51  ;;  %v751_v58 = vadd.f32 %v1702_v49, %v714_v52  ;;  %v699_v59 = vmul.f32 %v1697_v47, %v569_v55  ;;  %v715_v60 = vmul.f32 %v1697_v47, %v633_v56  ;;  %v571_v61 = vpop.f32.mrb[3].mxu0  ;;  %v635_v62 = vpop.f32.mrb[3].mxu1 }
 0x10f   : > { %v736_v63 = vadd.f32 %v1702_v49, %v699_v59  ;;  %v752_v0 = vadd.f32 %v1702_v49, %v715_v60  ;;  %v767_v1 = vmax.f32 %v735_v57, 0.0  ;;  %v783_v2 = vmax.f32 %v751_v58, 0.0 }
 0x111   : > { %v768_v3 = vmax.f32 %v736_v63, 0.0  ;;  %v784_v4 = vmax.f32 %v752_v0, 0.0 }
 0x112   : > { %v574_v5 = vpop.f32.mrb[4].mxu0  ;;  %v638_v6 = vpop.f32.mrb[4].mxu1 }
 0x113   : > { %v1221_v7 = vpack.c.bf16 %v768_v3, %v767_v1  ;;  %v1261_v8 = vpack.c.bf16 %v784_v4, %v783_v2  ;;  %v700_v9 = vmul.f32 %v1697_v47, %v574_v5  ;;  %v716_v10 = vmul.f32 %v1697_v47, %v638_v6  ;;  %v576_v11 = vpop.f32.mrb[5].mxu0  ;;  %v640_v12 = vpop.f32.mrb[5].mxu1 }
 0x114   : > { %v577_v13 = vpop.f32.mrb[6].mxu0  ;;  %v641_v14 = vpop.f32.mrb[6].mxu1 }
 0x115   : > { %1222 = vst [vmem:[%s1717_s19] sm:$0xff] %v1221_v7   ;;  %1305 = vst [vmem:[%s1717_s19 + $0x40] sm:$0xff] %v1261_v8   ;;  %v737_v15 = vadd.f32 %v1702_v49, %v700_v9  ;;  %v753_v16 = vadd.f32 %v1702_v49, %v716_v10  ;;  %v701_v17 = vmul.f32 %v1697_v47, %v577_v13  ;;  %v579_v19 = vpop.f32.mrb[7].mxu0  ;;  %v643_v20 = vpop.f32.mrb[7].mxu1 }
 0x116   : > { %v717_v18 = vmul.f32 %v1697_v47, %v641_v14 }
 0x117   : > { %v738_v21 = vadd.f32 %v1702_v49, %v701_v17  ;;  %v769_v23 = vmax.f32 %v737_v15, 0.0  ;;  %v785_v24 = vmax.f32 %v753_v16, 0.0 }
 0x118   : > { %v754_v22 = vadd.f32 %v1702_v49, %v717_v18 }
 0x119   : > { %v770_v25 = vmax.f32 %v738_v21, 0.0 }
 0x11a   : > { %v786_v26 = vmax.f32 %v754_v22, 0.0  ;;  %v582_v27 = vpop.f32.mrb[8].mxu0  ;;  %v646_v28 = vpop.f32.mrb[8].mxu1 }
 0x11b   : > { %v1226_v29 = vpack.c.bf16 %v770_v25, %v769_v23  ;;  %v702_v31 = vmul.f32 %v1697_v47, %v582_v27  ;;  %v718_v32 = vmul.f32 %v1697_v47, %v646_v28  ;;  %v584_v33 = vpop.f32.mrb[9].mxu0  ;;  %v648_v34 = vpop.f32.mrb[9].mxu1 }
 0x11c   : > { %v1266_v30 = vpack.c.bf16 %v786_v26, %v785_v24  ;;  %v585_v35 = vpop.f32.mrb[10].mxu0  ;;  %v649_v36 = vpop.f32.mrb[10].mxu1 }
 0x11d   : > { %1298 = vst [vmem:[%s1717_s19 + $0x8] sm:$0xff] %v1226_v29   ;;  %v739_v37 = vadd.f32 %v1702_v49, %v702_v31  ;;  %v755_v38 = vadd.f32 %v1702_v49, %v718_v32  ;;  %v703_v39 = vmul.f32 %v1697_v47, %v585_v35  ;;  %v719_v40 = vmul.f32 %v1697_v47, %v649_v36  ;;  %v587_v41 = vpop.f32.mrb[11].mxu0  ;;  %v651_v42 = vpop.f32.mrb[11].mxu1 }
 0x11e   : > { %1306 = vst [vmem:[%s1717_s19 + $0x48] sm:$0xff] %v1266_v30  }
 0x11f   : > { %v740_v43 = vadd.f32 %v1702_v49, %v703_v39  ;;  %v756_v44 = vadd.f32 %v1702_v49, %v719_v40  ;;  %v771_v45 = vmax.f32 %v739_v37, 0.0  ;;  %v787_v46 = vmax.f32 %v755_v38, 0.0 }
 0x121   : > { %v772_v48 = vmax.f32 %v740_v43, 0.0  ;;  %v788_v50 = vmax.f32 %v756_v44, 0.0 }
 0x122   : > { %v590_v51 = vpop.f32.mrb[12].mxu0  ;;  %v654_v52 = vpop.f32.mrb[12].mxu1 }
 0x123   : > { %v1231_v53 = vpack.c.bf16 %v772_v48, %v771_v45  ;;  %v1271_v54 = vpack.c.bf16 %v788_v50, %v787_v46  ;;  %v704_v55 = vmul.f32 %v1697_v47, %v590_v51  ;;  %v720_v56 = vmul.f32 %v1697_v47, %v654_v52  ;;  %v592_v57 = vpop.f32.mrb[13].mxu0  ;;  %v656_v58 = vpop.f32.mrb[13].mxu1 }
 0x124   : > { %v593_v59 = vpop.f32.mrb[14].mxu0  ;;  %v657_v60 = vpop.f32.mrb[14].mxu1 }
 0x125   : > { %1299 = vst [vmem:[%s1717_s19 + $0x10] sm:$0xff] %v1231_v53   ;;  %1307 = vst [vmem:[%s1717_s19 + $0x50] sm:$0xff] %v1271_v54   ;;  %v741_v61 = vadd.f32 %v1702_v49, %v704_v55  ;;  %v757_v62 = vadd.f32 %v1702_v49, %v720_v56  ;;  %v705_v63 = vmul.f32 %v1697_v47, %v593_v59  ;;  %v595_v1 = vpop.f32.mrb[15].mxu0  ;;  %v659_v2 = vpop.f32.mrb[15].mxu1 }
 0x126   : > { %v721_v0 = vmul.f32 %v1697_v47, %v657_v60 }
 0x127   : > { %v742_v3 = vadd.f32 %v1702_v49, %v705_v63  ;;  %v773_v5 = vmax.f32 %v741_v61, 0.0  ;;  %v789_v6 = vmax.f32 %v757_v62, 0.0 }
 0x128   : > { %v758_v4 = vadd.f32 %v1702_v49, %v721_v0 }
 0x129   : > { %v774_v7 = vmax.f32 %v742_v3, 0.0 }
 0x12a   : > { %v790_v8 = vmax.f32 %v758_v4, 0.0  ;;  %v598_v9 = vpop.f32.mrb[16].mxu0  ;;  %v662_v10 = vpop.f32.mrb[16].mxu1 }
 0x12b   : > { %v1236_v11 = vpack.c.bf16 %v774_v7, %v773_v5  ;;  %v706_v13 = vmul.f32 %v1697_v47, %v598_v9  ;;  %v722_v14 = vmul.f32 %v1697_v47, %v662_v10  ;;  %v600_v15 = vpop.f32.mrb[17].mxu0  ;;  %v664_v16 = vpop.f32.mrb[17].mxu1 }
 0x12c   : > { %v1276_v12 = vpack.c.bf16 %v790_v8, %v789_v6  ;;  %v601_v17 = vpop.f32.mrb[18].mxu0  ;;  %v665_v18 = vpop.f32.mrb[18].mxu1 }
 0x12d   : > { %1300 = vst [vmem:[%s1717_s19 + $0x18] sm:$0xff] %v1236_v11   ;;  %v743_v19 = vadd.f32 %v1702_v49, %v706_v13  ;;  %v759_v20 = vadd.f32 %v1702_v49, %v722_v14  ;;  %v707_v21 = vmul.f32 %v1697_v47, %v601_v17  ;;  %v723_v22 = vmul.f32 %v1697_v47, %v665_v18  ;;  %v603_v23 = vpop.f32.mrb[19].mxu0  ;;  %v667_v24 = vpop.f32.mrb[19].mxu1 }
 0x12e   : > { %1308 = vst [vmem:[%s1717_s19 + $0x58] sm:$0xff] %v1276_v12  }
 0x12f   : > { %v744_v25 = vadd.f32 %v1702_v49, %v707_v21  ;;  %v760_v26 = vadd.f32 %v1702_v49, %v723_v22  ;;  %v775_v27 = vmax.f32 %v743_v19, 0.0  ;;  %v791_v28 = vmax.f32 %v759_v20, 0.0 }
 0x131   : > { %v776_v29 = vmax.f32 %v744_v25, 0.0  ;;  %v792_v30 = vmax.f32 %v760_v26, 0.0 }
 0x132   : > { %v606_v31 = vpop.f32.mrb[20].mxu0  ;;  %v670_v32 = vpop.f32.mrb[20].mxu1 }
 0x133   : > { %v1241_v33 = vpack.c.bf16 %v776_v29, %v775_v27  ;;  %v1281_v34 = vpack.c.bf16 %v792_v30, %v791_v28  ;;  %v708_v35 = vmul.f32 %v1697_v47, %v606_v31  ;;  %v724_v36 = vmul.f32 %v1697_v47, %v670_v32  ;;  %v608_v37 = vpop.f32.mrb[21].mxu0  ;;  %v672_v38 = vpop.f32.mrb[21].mxu1 }
 0x134   : > { %v609_v39 = vpop.f32.mrb[22].mxu0  ;;  %v673_v40 = vpop.f32.mrb[22].mxu1 }
 0x135   : > { %1301 = vst [vmem:[%s1717_s19 + $0x20] sm:$0xff] %v1241_v33   ;;  %1309 = vst [vmem:[%s1717_s19 + $0x60] sm:$0xff] %v1281_v34   ;;  %v745_v41 = vadd.f32 %v1702_v49, %v708_v35  ;;  %v761_v42 = vadd.f32 %v1702_v49, %v724_v36  ;;  %v709_v43 = vmul.f32 %v1697_v47, %v609_v39  ;;  %v611_v45 = vpop.f32.mrb[23].mxu0  ;;  %v675_v46 = vpop.f32.mrb[23].mxu1 }
 0x136   : > { %v725_v44 = vmul.f32 %v1697_v47, %v673_v40 }
 0x137   : > { %v746_v48 = vadd.f32 %v1702_v49, %v709_v43  ;;  %v777_v51 = vmax.f32 %v745_v41, 0.0  ;;  %v793_v52 = vmax.f32 %v761_v42, 0.0 }
 0x138   : > { %v762_v50 = vadd.f32 %v1702_v49, %v725_v44 }
 0x139   : > { %v778_v53 = vmax.f32 %v746_v48, 0.0 }
 0x13a   : > { %v794_v54 = vmax.f32 %v762_v50, 0.0  ;;  %v614_v55 = vpop.f32.mrb[24].mxu0  ;;  %v678_v56 = vpop.f32.mrb[24].mxu1 }
 0x13b   : > { %v1246_v57 = vpack.c.bf16 %v778_v53, %v777_v51  ;;  %v710_v59 = vmul.f32 %v1697_v47, %v614_v55  ;;  %v726_v60 = vmul.f32 %v1697_v47, %v678_v56  ;;  %v616_v61 = vpop.f32.mrb[25].mxu0  ;;  %v680_v62 = vpop.f32.mrb[25].mxu1 }
 0x13c   : > { %v1286_v58 = vpack.c.bf16 %v794_v54, %v793_v52  ;;  %v617_v63 = vpop.f32.mrb[26].mxu0  ;;  %v681_v0 = vpop.f32.mrb[26].mxu1 }
 0x13d   : > { %1302 = vst [vmem:[%s1717_s19 + $0x28] sm:$0xff] %v1246_v57   ;;  %v747_v1 = vadd.f32 %v1702_v49, %v710_v59  ;;  %v763_v2 = vadd.f32 %v1702_v49, %v726_v60  ;;  %v711_v3 = vmul.f32 %v1697_v47, %v617_v63  ;;  %v727_v4 = vmul.f32 %v1697_v47, %v681_v0  ;;  %v619_v5 = vpop.f32.mrb[27].mxu0  ;;  %v683_v6 = vpop.f32.mrb[27].mxu1 }
 0x13e   : > { %1310 = vst [vmem:[%s1717_s19 + $0x68] sm:$0xff] %v1286_v58  }
 0x13f   : > { %v748_v7 = vadd.f32 %v1702_v49, %v711_v3  ;;  %v764_v8 = vadd.f32 %v1702_v49, %v727_v4  ;;  %v779_v9 = vmax.f32 %v747_v1, 0.0  ;;  %v795_v10 = vmax.f32 %v763_v2, 0.0 }
 0x141   : > { %v780_v11 = vmax.f32 %v748_v7, 0.0  ;;  %v796_v12 = vmax.f32 %v764_v8, 0.0 }
 0x142   : > { %v622_v13 = vpop.f32.mrb[28].mxu0  ;;  %v686_v14 = vpop.f32.mrb[28].mxu1 }
 0x143   : > { %v1251_v15 = vpack.c.bf16 %v780_v11, %v779_v9  ;;  %v1291_v16 = vpack.c.bf16 %v796_v12, %v795_v10  ;;  %v712_v17 = vmul.f32 %v1697_v47, %v622_v13  ;;  %v728_v18 = vmul.f32 %v1697_v47, %v686_v14  ;;  %v624_v19 = vpop.f32.mrb[29].mxu0  ;;  %v688_v20 = vpop.f32.mrb[29].mxu1 }
 0x144   : > { %v625_v21 = vpop.f32.mrb[30].mxu0  ;;  %v689_v22 = vpop.f32.mrb[30].mxu1 }
 0x145   : > { %1303 = vst [vmem:[%s1717_s19 + $0x30] sm:$0xff] %v1251_v15   ;;  %1311 = vst [vmem:[%s1717_s19 + $0x70] sm:$0xff] %v1291_v16   ;;  %v749_v23 = vadd.f32 %v1702_v49, %v712_v17  ;;  %v765_v24 = vadd.f32 %v1702_v49, %v728_v18  ;;  %v713_v25 = vmul.f32 %v1697_v47, %v625_v21  ;;  %v627_v27 = vpop.f32.mrb[31].mxu0  ;;  %v691_v28 = vpop.f32.mrb[31].mxu1 }
 0x146   : > { %v729_v26 = vmul.f32 %v1697_v47, %v689_v22 }
 0x147   : > { %v750_v29 = vadd.f32 %v1702_v49, %v713_v25  ;;  %v781_v31 = vmax.f32 %v749_v23, 0.0  ;;  %v797_v32 = vmax.f32 %v765_v24, 0.0 }
 0x148   : > { %v766_v30 = vadd.f32 %v1702_v49, %v729_v26 }
 0x149   : > { %v782_v33 = vmax.f32 %v750_v29, 0.0 }
 0x14a   : > { %v798_v34 = vmax.f32 %v766_v30, 0.0 }
 0x14b   : > { %v1256_v47 = vpack.c.bf16 %v782_v33, %v781_v31 }
 0x14c   : > { %v1296_v35 = vpack.c.bf16 %v798_v34, %v797_v32 }
 0x14d   : > { %1304 = vst [vmem:[%s1717_s19 + $0x38] sm:$0xff] %v1256_v47  }
 0x14e   : > { %1312 = vst [vmem:[%s1717_s19 + $0x78] sm:$0xff] %v1296_v35  }
 0x14f   : > { %1463 = shalt.err (!%p1460_p5)
}
 0x150   : > { %s1464_s6 = scalar_lea.hbm %s1792_s28, 2048  ;;  %s1468_s9 = scalar_lea.hbm %s1849_s3, 16384 }
 0x151   : > { %p1465_p6 = scmp.ne.s32.totalorder %s1792_s28, %s1464_s6  ;;  %p1469_p10 = scmp.lt.u32.totalorder %s1792_s28, %s1849_s3 }
 0x152   : > { %p1470_p11 = scmp.lt.u32.totalorder %s1468_s9, %s1464_s6  ;;  %p1472_p13 = scmp.lt.u32.totalorder %s1464_s6, %s1792_s28 }
 0x153   : > { %p1466_p7 = pnand %p1465_p6, %p1595_p4 }
 0x154   : > { %p1471_p12 = por %p1470_p11, %p1469_p10 }
 0x155   : > { %p1467_p9 = pneg %p1466_p7 }
 0x156   : > { %p1473_p0 = por %p1472_p13, %p1471_p12 }
 0x158   : > { %p1474_p1 = pnand %p1473_p0, %p1467_p9 }
 0x15a   : > { %1477 = shalt.err (!%p1474_p1)
}
 0x15b   : > { %s1533_s18 = smov 64   ;;  %s1534_s19 = smov 4  }
 0x15c   : > { %1333 = dma.vmem_to_hbm [thread:$0]  (%p1595_p4), %s1794_s23, 2048, %s1792_s28, %s1800_s15, %s1533_s18, %s1533_s18, %s1534_s19  }
 0x15d PF: > { %p1339_p2 = scmp.ge.s32.totalorder %s1528_s17, 2  ;;  %s989_s21 = sand.u32 1, %s1508_s12  }
 0x15e   : > { %s990_s26 = scalar_lea.sflag [#allocation3], %s989_s21 }
 0x15f   : > { %p1336_p3 = pnand %p1339_p2, %p1602_p8 }
 0x161   : > { %1503 = dma.done.wait (!%p1336_p3), %s990_s26, 2048  }
 0x162   : > { %1505 = vsyncadd (!%p1336_p3), %s990_s26, 4294965248  ;;  %s16_s17 = sadd.s32 1, %s1528_s17   ;;  %s1852_s12 = smov %s1512_s13 }
 0x163   : > { %p13_p5 = scmp.ge.s32.totalorder %s16_s17, 10   ;;  %s1853_s13 = smov %s1516_s14 }
 0x164   : > { %s1854_s14 = smov %s1608_s25  ;;  %s1855_s15 = smov %s1524_s16 }
 0x165   : > { %s1856_s16 = smov %s1858_s20  ;;  %15 = sbr.rel (!%p13_p5) target bundleno = 4 (0x4), region = 73 }
 0x16c   :  { %995 = vsyncpa [#allocation3], 1 }
 0x16d   :  { %997 = vsyncpa [#allocation3 + $0x1], 1 }

</bundles_post_ra>
